<compile_context>
chip_gen: v7x
topology: tpu7x:2x2x1
jax: 0.10.0
libtpu: 0.0.40
codegen_flags: <defaults>
</compile_context>

<pallas_src>
import jax
import jax.numpy as jnp
from jax.experimental import pallas as pl
from jax.experimental.pallas import tpu as pltpu


# ---------------------------------------------------------------------------
# Kernel
# ---------------------------------------------------------------------------
def _graph_agg_kernel(x_ref, w_ref, b_ref, o_ref):
    # x_ref: (tb*N, Fin)   flattened batch-tile of node features (lane-dense)
    # w_ref: (Fin, 2*P)    fused [Ws | Wt] weights (P = padded out_features)
    # b_ref: (1, 2*P)      fused [bs | bt] bias, f32
    # o_ref: (tb, P)       per-batch-element aggregated output
    tb, P = o_ref.shape
    rows = x_ref.shape[0]
    n = rows // tb                         # nodes per batch element

    # Single MXU matmul for both linear layers; f32 accumulation.
    z = jnp.dot(x_ref[...], w_ref[...], preferred_element_type=jnp.float32)
    z = z + b_ref[...]                     # f32 bias broadcast

    zi = z[:, :P]                          # sigmoid branch pre-activation
    zj = z[:, P:]                          # tanh branch pre-activation

    # sigmoid(x) == 0.5*(tanh(0.5*x)+1): one EUP op instead of exp + reciprocal.
    gate = 0.5 * (jnp.tanh(0.5 * zi) + 1.0)
    prod = gate * jnp.tanh(zj)             # (rows, P) f32

    # Sum over the node axis (torch.sum(..., dim=1)).  Only this small f32
    # intermediate is reshaped; the streamed x block stays 2-D.
    s = jnp.sum(prod.reshape(tb, n, P), axis=1)

    s = jnp.where(s >= 0, s, 0.1 * s)      # LeakyReLU(0.1)
    # TODO(synk): Dropout is identity in eval mode; training-mode dropout
    # (pltpu.prng_seed / prng_random_bits mask scaled by 1/(1-p)) not applied.
    o_ref[...] = s.astype(o_ref.dtype)


# ---------------------------------------------------------------------------
# Tiling
# ---------------------------------------------------------------------------
_VMEM_BUDGET_BYTES = 24 << 20     # conservative per-step working set (fits v5e/v6e/v7x)
_VMEM_LIMIT_BYTES = 32 << 20      # scoped VMEM limit passed to the compiler
_TARGET_X_BLOCK_BYTES = 2 << 20   # ~2 MiB of x per grid step (HBM-roofline sweet spot)
_MIN_SPLIT_BYTES = 512 << 10      # below this total, one grid step is cheapest


def _pick_batch_tile(B, N, Fin, x_itemsize, out_pad):
    """Batch elements per grid step: VMEM/byte aware, divisor of B, 8-row
    aligned blocks, and >=2 steps (when worthwhile) so the 'parallel' batch
    axis can shard across v7x's two TensorCores."""
    elem_x_bytes = N * Fin * x_itemsize
    total_x_bytes = B * elem_x_bytes
    if B < 2 or total_x_bytes <= _MIN_SPLIT_BYTES:
        return B                                       # tiny: single full-batch step

    # Working-set estimate per batch element inside one block:
    #   double-buffered x rows + f32 intermediates (z, gates, product) + output.
    per_elem_vmem = 2 * elem_x_bytes + N * 3 * (2 * out_pad) * 4 + 2 * out_pad * 4
    fixed_vmem = 4 * Fin * (2 * out_pad) * 4 + 4 * (2 * out_pad) * 4
    tb_vmem = max(1, (_VMEM_BUDGET_BYTES - fixed_vmem) // per_elem_vmem)
    tb_bytes = max(1, _TARGET_X_BLOCK_BYTES // elem_x_bytes)
    tb = int(max(1, min(B // 2, tb_vmem, tb_bytes)))   # >=2 steps for v7x megacore

    # Largest tb <= target that divides B with 8-row-aligned blocks
    # (keeps both the (tb*N, Fin) input block and (tb, P) output block legal).
    best = 0
    t = tb
    while t >= 8:
        if B % t == 0 and t % 8 == 0:
            best = t
            break
        t -= 1
    if best >= max(8, tb // 8):
        return best
    # No good divisor: fall back to one full-batch step if it fits the budget.
    if B <= tb_vmem or best == 0:
        return B
    return best


# ---------------------------------------------------------------------------
# Parameter fusion (call once, off the per-call critical path)
# ---------------------------------------------------------------------------
def fuse_graph_aggregation_params(ws, bs, wt, bt, *, dtype=jnp.bfloat16):
    """Fuse + pad parameters once at load time.

    ws/wt: (Fin, out) weights (already transposed to (in, out)); bs/bt: (1, out).
    Each half is zero-padded to P = round_up(out, 64) lanes (so z is 128-lane
    dense) and concatenated to a single (Fin, 2*P) matrix.  Weights default to
    bf16 (native MXU input on all generations, halves weight HBM traffic);
    bias stays f32 (added post-accumulation).
    """
    Fin, out_features = ws.shape
    bs = jnp.asarray(bs).reshape(1, out_features)
    bt = jnp.asarray(bt).reshape(1, out_features)
    P = ((out_features + 63) // 64) * 64
    pad = P - out_features
    if pad:
        ws = jnp.pad(ws, ((0, 0), (0, pad)))
        wt = jnp.pad(wt, ((0, 0), (0, pad)))
        bs = jnp.pad(bs, ((0, 0), (0, pad)))
        bt = jnp.pad(bt, ((0, 0), (0, pad)))
    w_cat = jnp.concatenate([ws, wt], axis=1).astype(dtype)       # (Fin, 2*P)
    b_cat = jnp.concatenate([bs, bt], axis=1).astype(jnp.float32)  # (1, 2*P)
    return w_cat, b_cat, out_features


# ---------------------------------------------------------------------------
# Wrapper
# ---------------------------------------------------------------------------
def graph_aggregation(x, w_cat, b_cat, out_features, *, batch_tile=None):
    """x: (B, N, Fin) in its stored dtype (f32 or bf16; never cast here — an
    extra wrapper-side cast would add a full HBM pass to a memory-bound kernel).
    Returns (B, out_features) in x.dtype."""
    B, N, Fin = x.shape
    two_p = w_cat.shape[1]
    P = two_p // 2
    assert w_cat.shape[0] == Fin

    if w_cat.dtype != x.dtype:
        w_cat = w_cat.astype(x.dtype)      # weights are tiny; x is never cast

    x2d = x.reshape(B * N, Fin)            # free row-major collapse in XLA

    tb = batch_tile if batch_tile is not None else _pick_batch_tile(
        B, N, Fin, x.dtype.itemsize, P)
    assert B % tb == 0, "batch tile must divide B"
    grid = (B // tb,)

    out_padded = pl.pallas_call(
        _graph_agg_kernel,
        out_shape=jax.ShapeDtypeStruct((B, P), x.dtype),
        grid_spec=pltpu.PrefetchScalarGridSpec(
            num_scalar_prefetch=0,
            grid=grid,
            in_specs=[
                # Streamed lane-dense 2-D x block.  (If profiling shows exposed
                # DMA on v5e/v6e, pipeline_mode=pl.Buffered(3) has VMEM headroom.)
                pl.BlockSpec((tb * N, Fin), lambda b: (b, 0)),
                pl.BlockSpec((Fin, two_p), lambda b: (0, 0)),   # resident weights
                pl.BlockSpec((1, two_p), lambda b: (0, 0)),     # resident bias
            ],
            out_specs=pl.BlockSpec((tb, P), lambda b: (b, 0)),
        ),
        compiler_params=pltpu.CompilerParams(
            dimension_semantics=("parallel",),
            vmem_limit_bytes=_VMEM_LIMIT_BYTES),
    )(x2d, w_cat, b_cat)

    if P != out_features:
        out_padded = out_padded[:, :out_features]   # drop lane padding
    return out_padded


# ---------------------------------------------------------------------------
# Pure-JAX reference
# ---------------------------------------------------------------------------
def reference(x, ws, bs, wt, bt):
    i = jax.nn.sigmoid(jnp.einsum("bnf,fo->bno", x, ws) + bs)
    j = jnp.tanh(jnp.einsum("bnf,fo->bno", x, wt) + bt)
    s = jnp.sum(i * j, axis=1)
    return jnp.where(s >= 0, s, 0.1 * s)


if __name__ == "__main__":
    # Module config: in_features=24, m_dim=8 -> Fin=32, out_features=32
    B, N = 2, 8
    in_features, m_dim, out_features = 24, 8, 32
    Fin = in_features + m_dim

    key = jax.random.PRNGKey(0)
    kx, kws, kbs, kwt, kbt = jax.random.split(key, 5)

    x = jax.random.normal(kx, (B, N, Fin), dtype=jnp.float32)
    bound = 1.0 / (Fin ** 0.5)   # nn.Linear-style uniform init
    ws = jax.random.uniform(kws, (Fin, out_features), jnp.float32, -bound, bound)
    bs = jax.random.uniform(kbs, (1, out_features), jnp.float32, -bound, bound)
    wt = jax.random.uniform(kwt, (Fin, out_features), jnp.float32, -bound, bound)
    bt = jax.random.uniform(kbt, (1, out_features), jnp.float32, -bound, bound)

    ref = reference(x, ws, bs, wt, bt)

    # f32 path (params fused once, f32 weights for tight agreement).
    w32, b32, outf = fuse_graph_aggregation_params(ws, bs, wt, bt, dtype=jnp.float32)
    out = graph_aggregation(x, w32, b32, outf)
    jax.block_until_ready(out)
    assert out.shape == (B, out_features)
    assert jnp.allclose(out, ref, atol=2e-5, rtol=2e-5), "f32 mismatch vs reference"

    # bf16 storage path: x arrives in bf16 from the upstream producer (no
    # wrapper-side cast); weights fused in bf16.  Loose tolerance expected.
    wbf, bbf, outf = fuse_graph_aggregation_params(ws, bs, wt, bt, dtype=jnp.bfloat16)
    x_bf16 = x.astype(jnp.bfloat16)     # stands in for bf16-stored activations
    out_bf16 = graph_aggregation(x_bf16, wbf, bbf, outf)
    jax.block_until_ready(out_bf16)
    assert jnp.allclose(out_bf16.astype(jnp.float32), ref, atol=5e-2, rtol=5e-2), \
        "bf16 path mismatch"

    print("KERNEL_OK")
</pallas_src>

<mosaic_0001>
module attributes {stable_mosaic.version = 11 : i64} {
  func.func @_graph_agg_kernel(%arg0: i32, %arg1: memref<16x32xf32, #tpu.memory_space<vmem>>, %arg2: memref<32x128xf32, #tpu.memory_space<vmem>>, %arg3: memref<1x128xf32, #tpu.memory_space<vmem>>, %arg4: memref<2x64xf32, #tpu.memory_space<vmem>>) attributes {dimension_semantics = [#tpu.dimension_semantics<parallel>], iteration_bounds = array<i64: 1>, scalar_prefetch = 0 : i64, scratch_operands = 0 : i64, tpu.core_type = #tpu.core_type<tc>, window_params = [{transform_indices = @transform_0, window_bounds = array<i64: 16, 32>}, {pipeline_mode = #tpu.pipeline_mode<synchronous>, transform_indices = @transform_1, window_bounds = array<i64: 32, 128>}, {pipeline_mode = #tpu.pipeline_mode<synchronous>, transform_indices = @transform_2, window_bounds = array<i64: 1, 128>}, {transform_indices = @transform_3, window_bounds = array<i64: 2, 64>}]} {
    %c0 = arith.constant 0 : index
    %c0_0 = arith.constant 0 : index
    %0 = vector.load %arg1[%c0, %c0_0] : memref<16x32xf32, #tpu.memory_space<vmem>>, vector<16x32xf32>
    %c0_1 = arith.constant 0 : index
    %c0_2 = arith.constant 0 : index
    %1 = vector.load %arg2[%c0_1, %c0_2] : memref<32x128xf32, #tpu.memory_space<vmem>>, vector<32x128xf32>
    %cst = arith.constant dense<0.000000e+00> : vector<16x128xf32>
    %2 = tpu.matmul %0, %1, %cst {dimension_numbers = #tpu.dot_dimension_numbers<[1], [0], [0], [1], [0, 0, 1, 1], [], []>} : vector<16x32xf32>, vector<32x128xf32>, vector<16x128xf32> -> vector<16x128xf32>
    %c0_3 = arith.constant 0 : index
    %c0_4 = arith.constant 0 : index
    %3 = vector.load %arg3[%c0_3, %c0_4] : memref<1x128xf32, #tpu.memory_space<vmem>>, vector<1x128xf32>
    %4 = vector.broadcast %3 : vector<1x128xf32> to vector<16x128xf32>
    %5 = arith.addf %2, %4 : vector<16x128xf32>
    %6 = vector.extract_strided_slice %5 {offsets = [0, 0], sizes = [16, 64], strides = [1, 1]} : vector<16x128xf32> to vector<16x64xf32>
    %7 = vector.extract_strided_slice %5 {offsets = [0, 64], sizes = [16, 64], strides = [1, 1]} : vector<16x128xf32> to vector<16x64xf32>
    %cst_5 = arith.constant 5.000000e-01 : f32
    %8 = vector.broadcast %cst_5 : f32 to vector<16x64xf32>
    %9 = arith.mulf %8, %6 : vector<16x64xf32>
    %10 = math.tanh %9 : vector<16x64xf32>
    %cst_6 = arith.constant 1.000000e+00 : f32
    %11 = vector.broadcast %cst_6 : f32 to vector<16x64xf32>
    %12 = arith.addf %10, %11 : vector<16x64xf32>
    %cst_7 = arith.constant 5.000000e-01 : f32
    %13 = vector.broadcast %cst_7 : f32 to vector<16x64xf32>
    %14 = arith.mulf %13, %12 : vector<16x64xf32>
    %15 = math.tanh %7 : vector<16x64xf32>
    %16 = arith.mulf %14, %15 : vector<16x64xf32>
    %17 = vector.shape_cast %16 : vector<16x64xf32> to vector<2x8x64xf32>
    %cst_8 = arith.constant dense<0.000000e+00> : vector<2x64xf32>
    %18 = vector.multi_reduction <add>, %17, %cst_8 [1] : vector<2x8x64xf32> to vector<2x64xf32>
    %cst_9 = arith.constant 0.000000e+00 : f32
    %19 = vector.broadcast %cst_9 : f32 to vector<2x64xf32>
    %20 = arith.cmpf oge, %18, %19 : vector<2x64xf32>
    %cst_10 = arith.constant 1.000000e-01 : f32
    %21 = vector.broadcast %cst_10 : f32 to vector<2x64xf32>
    %22 = arith.mulf %21, %18 : vector<2x64xf32>
    %23 = arith.select %20, %18, %22 : vector<2x64xi1>, vector<2x64xf32>
    %c0_11 = arith.constant 0 : index
    %c0_12 = arith.constant 0 : index
    %24 = vector.load %arg4[%c0_11, %c0_12] : memref<2x64xf32, #tpu.memory_space<vmem>>, vector<2x64xf32>
    tpu.vector_store %arg4[%c0_11, %c0_12], %23 {strides = array<i32>} : memref<2x64xf32, #tpu.memory_space<vmem>>, vector<2x64xf32>,
    return
  }
  func.func @transform_0(%arg0: i32) -> (i32, i32) {
    %c0_i32 = arith.constant 0 : i32
    %c0_i32_0 = arith.constant 0 : i32
    return %arg0, %c0_i32 : i32, i32
  }
  func.func @transform_1(%arg0: i32) -> (i32, i32) {
    %c0_i32 = arith.constant 0 : i32
    %c0_i32_0 = arith.constant 0 : i32
    %c0_i32_1 = arith.constant 0 : i32
    return %c0_i32, %c0_i32_0 : i32, i32
  }
  func.func @transform_2(%arg0: i32) -> (i32, i32) {
    %c0_i32 = arith.constant 0 : i32
    %c0_i32_0 = arith.constant 0 : i32
    %c0_i32_1 = arith.constant 0 : i32
    return %c0_i32, %c0_i32_0 : i32, i32
  }
  func.func @transform_3(%arg0: i32) -> (i32, i32) {
    %c0_i32 = arith.constant 0 : i32
    %c0_i32_0 = arith.constant 0 : i32
    return %arg0, %c0_i32 : i32, i32
  }
}

</mosaic_0001>

<bundles_post_ra>
// kernel: tpu_custom_call.1
= control target key start
LH: loop header
LB: loop body
LE: loop exit
PB: predicated region body
PF: predicated region fallthrough
CT: control target
= control target key end

     0   :  { %8 = vsyncpa [#allocation3], 0  ;;  %s381_s0 = inlined_call_operand.hbm [shape: f32[16,32], index: 0, kind: input, shape index: {}]   ;;  %s382_s1 = inlined_call_operand.hbm [shape: f32[32,128], index: 1, kind: input, shape index: {}]   ;;  %s383_s2 = inlined_call_operand.vmem [shape: f32[1,128], index: 2, kind: input, shape index: {}]   ;;  %s384_s3 = inlined_call_operand.hbm [shape: f32[2,64], index: 3, kind: output, shape index: {}]  }
   0x1   :  { %9 = vsyncpa [#allocation6], 0 }
   0x2   :  { %10 = vsyncpa [#allocation4], 0  ;;  %s316_s12 = smov [#allocation2]   ;;  %s244_s16 = scalar_lea.hbm %s381_s0, 256 }
   0x3   :  { %s16_s13 = sshll.u32 %s316_s12, 4  ;;  %p245_p0 = scmp.ne.s32.totalorder %s381_s0, %s244_s16  ;;  %s17_s13 = int_to_ptr.vmem [resolvable:$true] %s16_s13 }
   0x4   :  { %p248_p1 = scmp.lt.u32.totalorder %s244_s16, %s381_s0 }
   0x6   :  { %p250_p2 = pnand %p248_p1, %p245_p0 }
   0x8   :  { %253 = shalt.err (!%p250_p2)
}
   0x9   :  { %s254_s21 = scalar_lea.vmem %s17_s13, 256  ;;  %p259_p4 = scmp.lt.s32.totalorder %s17_s13, %s17_s13 }
   0xa   :  { %p255_p3 = scmp.ne.s32.totalorder %s17_s13, %s254_s21  ;;  %p260_p5 = scmp.lt.s32.totalorder %s254_s21, %s254_s21 }
   0xc   :  { %p261_p6 = por %p260_p5, %p259_p4 }
   0xe   :  { %p262_p7 = pnand %p261_p6, %p255_p3 }
  0x10   :  { %265 = shalt.err (!%p262_p7)
}
  0x11   :  { %s317_s22 = smov 128   ;;  %s318_s23 = smov 8  }
  0x12   :  { %22 = dma.hbm_to_vmem [thread:$0]  %s381_s0, 256, %s17_s13, [#allocation3], %s317_s22, %s317_s22, %s318_s23  }
  0x13   :  { %s319_s26 = smov [#allocation5]   ;;  %s266_s30 = scalar_lea.hbm %s382_s1, 512 }
  0x14   :  { %s28_s27 = sshll.u32 %s319_s26, 4  ;;  %p267_p8 = scmp.ne.s32.totalorder %s382_s1, %s266_s30  ;;  %s29_s27 = int_to_ptr.vmem [resolvable:$true] %s28_s27 }
  0x15   :  { %p270_p9 = scmp.lt.u32.totalorder %s266_s30, %s382_s1 }
  0x17   :  { %p272_p10 = pnand %p270_p9, %p267_p8 }
  0x19   :  { %275 = shalt.err (!%p272_p10)
}
  0x1a   :  { %s276_s8 = scalar_lea.vmem %s29_s27, 512  ;;  %p281_p12 = scmp.lt.s32.totalorder %s29_s27, %s29_s27 }
  0x1b   :  { %p277_p11 = scmp.ne.s32.totalorder %s29_s27, %s276_s8  ;;  %p282_p13 = scmp.lt.s32.totalorder %s276_s8, %s276_s8 }
  0x1d   :  { %p283_p0 = por %p282_p13, %p281_p12 }
  0x1f   :  { %p284_p1 = pnand %p283_p0, %p277_p11 }
  0x21   :  { %287 = shalt.err (!%p284_p1)
}
  0x22   :  { %34 = dma.hbm_to_vmem [thread:$0]  %s382_s1, 512, %s29_s27, [#allocation6], %s317_s22, %s317_s22, %s318_s23  }
  0x23   :  { %310 = dma.done.wait [#allocation3], 256  }
  0x24   :  { %311 = vsyncadd [#allocation3], 4294967040 }
  0x25   :  { %312 = dma.done.wait [#allocation6], 512  }
  0x26   :  { %313 = vsyncadd [#allocation6], 4294966784  ;;  %vm56_vm0 = vcmask 261120   ;;  %v45_v0 = vld [vmem:[#allocation5] sm:$0xff]  ;;  %v46_v1 = vld [vmem:[#allocation5 + $0x8] sm:$0xff]  ;;  %s320_s11 = smov 64  }
  0x27   :  { %v47_v2 = vld [vmem:[#allocation5 + $0x10] sm:$0xff]  ;;  %v222_v3 = vpack.c.bf16 %v46_v1, %v45_v0  ;;  %v48_v4 = vld [vmem:[#allocation5 + $0x18] sm:$0xff]  ;;  %vm158_vm1 = vcmask 523264   ;;  %vm181_vm4 = vcmask 1041409   ;;  %vm184_vm5 = vcmask 517120  }
  0x28   :  { %v43_v5 = vld [vmem:[#allocation2] sm:$0xff]  ;;  %v226_v6 = vpack.c.bf16 %v48_v4, %v47_v2  ;;  %v44_v7 = vld [vmem:[#allocation2 + $0x8] sm:$0xff] }
  0x29   :  { %219 = vmatprep.mubr.msk.f32.mxu0 %vm56_vm0, %v43_v5  ;;  %223 = vmatprep.subr.bf16.mxu0 %v222_v3  ;;  %v202_v8 = vld [vmem:[%s383_s2] ss:$0 sm:$0xff]  ;;  %s321_s2 = smov [#allocation7]  }
  0x2a   :  { %225 = vmatpush3.bf16.msra.mxu0 %v222_v3  ;;  %s192_s12 = sshll.u32 %s321_s2, 4  ;;  %s193_s12 = int_to_ptr.vmem [resolvable:$true] %s192_s12 }
  0x2b   :  { %227 = vmatprep.subr.bf16.mxu0 %v226_v6  ;;  %s288_s13 = scalar_lea.vmem %s193_s12, 32  ;;  %p293_p3 = scmp.lt.s32.totalorder %s193_s12, %s193_s12 }
  0x2c   :  { %p289_p2 = scmp.ne.s32.totalorder %s193_s12, %s288_s13  ;;  %p294_p4 = scmp.lt.s32.totalorder %s288_s13, %s288_s13 }
  0x2e   :  { %229 = vmatpush3.bf16.msra.mxu0 %v226_v6  ;;  %p295_p5 = por %p294_p4, %p293_p3 }
  0x30   :  { %p296_p6 = pnand %p295_p5, %p289_p2 }
  0x31   :  { %220 = vmatmul.mubr.msk.f32.vlgmr.msra.gmra.mrb[0].mxu0 %vm56_vm0, %v44_v7 }
 0x104   :  { %v221_v9 = vpop.f32.mrb[0].mxu0 }
 0x105   :  { %v129_v10 = vpop.f32.mrb[1].mxu0  ;;  %v135_v12 = vadd.f32 %v221_v9, %v202_v8 }
 0x106   :  { %v130_v11 = vadd.f32 %v202_v8, %v129_v10 }
 0x107   :  { %v139_v16 = vmul.f32 0.5, %v135_v12 }
 0x108   :  { %236 = vtanh.f32 %v130_v11  ;;  %v138_v15 = vmul.f32 0.5, %v130_v11 }
 0x109   :  { %238 = vtanh.f32 %v135_v12 }
 0x10a   :  { %240 = vtanh.f32 %v138_v15 }
 0x10b   :  { %242 = vtanh.f32 %v139_v16 }
 0x112   :  { %v237_v13 = vpop.eup %236 }
 0x113   :  { %150 = vrot.lane.b32.xlu0 %v237_v13, %s320_s11  ;;  %v239_v14 = vpop.eup %238 }
 0x114   :  { %v241_v17 = vpop.eup %240 }
 0x115   :  { %v142_v18 = vadd.f32 1.0, %v241_v17  ;;  %v243_v19 = vpop.eup %242 }
 0x116   :  { %v143_v21 = vadd.f32 1.0, %v243_v19 }
 0x117   :  { %152 = vrot.lane.b32.xlu0 %v239_v14, %s320_s11  ;;  %v144_v20 = vmul.f32 0.5, %v142_v18 }
 0x118   :  { %v145_v25 = vmul.f32 0.5, %v143_v21 }
 0x185   :  { %v151_v22 = vpop.permute.xlu0 %150 }
 0x186   :  { %v156_v23 = vmul.f32 %v151_v22, %v144_v20 }
 0x188   :  { %v159_v24 = vsel %vm158_vm1, %v156_v23, 0.0 }
 0x189   :  { %v160_v26 = vrot.slane %v159_v24, 4  ;;  %v153_v27 = vpop.permute.xlu0 %152 }
 0x18a   :  { %v157_v28 = vmul.f32 %v153_v27, %v145_v25 }
 0x18b   :  { %v161_v29 = vadd.f32 %v160_v26, %v159_v24 }
 0x18c   :  { %v166_v30 = vsel %vm158_vm1, %v157_v28, 0.0 }
 0x18d   :  { %v162_v31 = vrot.slane %v161_v29, 2  ;;  %v167_v32 = vrot.slane %v166_v30, 4 }
 0x18f   :  { %v163_v33 = vadd.f32 %v162_v31, %v161_v29  ;;  %v168_v34 = vadd.f32 %v167_v32, %v166_v30 }
 0x191   :  { %v164_v35 = vrot.slane %v163_v33, 1  ;;  %v169_v36 = vrot.slane %v168_v34, 2 }
 0x193   :  { %v165_v37 = vadd.f32 %v164_v35, %v163_v33  ;;  %v170_v38 = vadd.f32 %v169_v36, %v168_v34 }
 0x195   :  { %v171_v39 = vrot.slane %v170_v38, 1  ;;  %v175_v41 = vmul.f32 0.1, %v165_v37  ;;  %vm173_vm2 = vcmp.ge.f32.partialorder %v165_v37, 0.0 }
 0x197   :  { %v172_v40 = vadd.f32 %v171_v39, %v170_v38  ;;  %v177_v43 = vsel %vm173_vm2, %v165_v37, %v175_v41 }
 0x199   :  { %vm174_vm3 = vcmp.ge.f32.partialorder %v172_v40, 0.0  ;;  %v176_v42 = vmul.f32 0.1, %v172_v40 }
 0x19b   :  { %v178_v44 = vsel %vm174_vm3, %v172_v40, %v176_v42 }
 0x19c   :  { %v182_v45 = vsel %vm181_vm4, %v178_v44, %v177_v43 }
 0x19d   :  { %185 = vst.msk [vmem:[#allocation7] sm:$0x3] %vm184_vm5, %v182_v45 }
 0x19e   :  { %299 = shalt.err (!%p296_p6)
}
 0x19f   :  { %s300_s16 = scalar_lea.hbm %s384_s3, 32 }
 0x1a0   :  { %p301_p7 = scmp.ne.s32.totalorder %s384_s3, %s300_s16  ;;  %p304_p8 = scmp.lt.u32.totalorder %s300_s16, %s384_s3 }
 0x1a2   :  { %p306_p9 = pnand %p304_p8, %p301_p7 }
 0x1a4   :  { %309 = shalt.err (!%p306_p9)
}
 0x1a5   :  { %195 = dma.vmem_to_hbm [thread:$0]  %s193_s12, 32, %s384_s3, [#allocation4]  }
 0x1a6   :  { %314 = dma.done.wait [#allocation4], 32  }
 0x1a7   :  { %315 = vsyncadd [#allocation4], 4294967264 }
 0x1a8   :  { %199 = vsyncpa [#allocation3], 1 }
 0x1a9   :  { %200 = vsyncpa [#allocation6], 1 }
 0x1aa   :  { %201 = vsyncpa [#allocation4], 1 }

</bundles_post_ra>
